<compile_context>
chip_gen: v7x
topology: tpu7x:2x2x1
jax: 0.10.0
libtpu: 0.0.40
codegen_flags: <defaults>
</compile_context>

<pallas_src>
import functools
import math

import jax
import jax.numpy as jnp
from jax.experimental import pallas as pl
from jax.experimental.pallas import tpu as pltpu

_EPS = 1e-5
_TWO_PI = 2.0 * math.pi
_TM_CAP = 16384                      # lane-dim tile cap (elements)


# ---------------------------------------------------------------------------
# Generation-aware sizing
# ---------------------------------------------------------------------------
def _vmem_budget():
    """Returns (vmem_limit_bytes, per-block budget bytes) for this TPU."""
    phys = 64 << 20                  # conservative default (v7x-class)
    try:
        info = pltpu.get_tpu_info()
        phys = int(getattr(info, "vmem_capacity_bytes", phys) or phys)
    except Exception:
        pass
    if phys >= (128 << 20):          # v5e / v6e: 128 MiB physical VMEM
        return 64 << 20, 6 << 20
    return 48 << 20, 4 << 20         # v7x: 64 MiB physical VMEM


def _pick_m_tile(m2p, cap=_TM_CAP):
    """Largest multiple-of-128 divisor of m2p, capped."""
    best = 128
    t = 128
    while t <= min(m2p, cap):
        if m2p % t == 0:
            best = t
        t += 128
    return best


def _pick_c_tile(c, tm, block_budget):
    """Multiple-of-8 divisor of C under the block budget; prefer >=2 C tiles."""
    if c % 8 != 0:
        return c
    cands = [d for d in range(8, c + 1, 8)
             if c % d == 0 and d * tm * 4 <= block_budget]
    if not cands:
        return 8
    two_tc = [d for d in cands if c // d >= 2]
    return max(two_tc) if two_tc else max(cands)


def _pick_fused_c_tile(c, n, m2p, vmem_limit):
    """C tile for the fused single-pass path, or None if it does not fit VMEM."""
    headroom = 4 << 20                      # params + compiler scratch

    def fits(ct):
        # input + output slabs, double-buffered by the pipeline.
        return 4 * (n * ct * m2p * 4) + headroom <= vmem_limit

    if c % 8 != 0:
        return c if fits(c) else None
    cands = [d for d in range(8, c + 1, 8) if c % d == 0 and fits(d)]
    if not cands:
        return None
    two_tc = [d for d in cands if c // d >= 2]
    return max(two_tc) if two_tc else max(cands)


# ---------------------------------------------------------------------------
# Two-pass path
# ---------------------------------------------------------------------------
def _stats_kernel(x_ref, sum_ref, sq_ref):
    """Pass 1: lane-interleaved per-lane sum / sum-of-squares partials."""
    ni = pl.program_id(1)
    mi = pl.program_id(2)

    @pl.when(jnp.logical_and(ni == 0, mi == 0))
    def _():
        sum_ref[...] = jnp.zeros_like(sum_ref)
        sq_ref[...] = jnp.zeros_like(sq_ref)

    tm = x_ref.shape[1]
    nchunks = tm // 128

    def body(k, carry):
        s, q = carry
        off = pl.multiple_of(k * 128, 128)
        chunk = x_ref[:, pl.ds(off, 128)].astype(jnp.float32)
        return s + chunk, q + chunk * chunk

    s, q = jax.lax.fori_loop(0, nchunks, body, (sum_ref[...], sq_ref[...]),
                             unroll=min(8, nchunks))
    sum_ref[...] = s
    sq_ref[...] = q


def _norm_kernel(x_ref, scale_ref, shift_ref, o_ref):
    """Pass 2: out = x * scale + shift with lane-interleaved (ct, 128) params."""
    scale = scale_ref[...]
    shift = shift_ref[...]
    tm = x_ref.shape[1]
    nchunks = tm // 128

    def body(k, carry):
        off = pl.multiple_of(k * 128, 128)
        chunk = x_ref[:, pl.ds(off, 128)].astype(jnp.float32)
        o_ref[:, pl.ds(off, 128)] = (chunk * scale + shift).astype(o_ref.dtype)
        return carry

    jax.lax.fori_loop(0, nchunks, body, 0, unroll=min(8, nchunks))


def _two_pass(xf, gamma_eff, beta_eff, n, c, m2p, cnt, eps,
              vmem_limit, block_budget, out_dtype):
    tm = _pick_m_tile(m2p)
    ct = _pick_c_tile(c, tm, block_budget)
    grid = (c // ct, n, m2p // tm)

    x_spec = pl.BlockSpec((None, ct, tm), lambda ci, ni, mi: (ni, ci, mi))
    part_spec = pl.BlockSpec((ct, 128), lambda ci, ni, mi: (ci, 0))

    def cparams(sem):
        return pltpu.CompilerParams(dimension_semantics=sem,
                                    vmem_limit_bytes=vmem_limit)

    # ---- pass 1: raw per-lane (C, 128) sum / sumsq partials --------------
    part_shape = jax.ShapeDtypeStruct((c, 128), jnp.float32)
    sum_p, sq_p = pl.pallas_call(
        _stats_kernel,
        out_shape=(part_shape, part_shape),
        grid=grid,
        in_specs=[x_spec],
        out_specs=(part_spec, part_spec),
        compiler_params=cparams(("parallel", "arbitrary", "arbitrary")),
    )(xf)

    # ---- O(C*128) stat fold in XLA ---------------------------------------
    s2 = sum_p.reshape(c, 64, 2).sum(axis=1)       # (C, 2): [:,0] real, [:,1] imag
    q2 = sq_p.reshape(c, 64, 2).sum(axis=1)
    mean = s2 / cnt
    var = jnp.maximum(q2 / cnt - mean * mean, 0.0)  # guard E[x^2]-m^2 cancellation
    rstd = jax.lax.rsqrt(var + eps)
    scale = gamma_eff * rstd                        # 2*pi already in imag column
    shift = beta_eff - mean * scale
    scale_il = jnp.tile(scale, (1, 64))             # (C, 128), lane-interleaved
    shift_il = jnp.tile(shift, (1, 64))

    # ---- pass 2: normalize + affine, fully parallel -----------------------
    out = pl.pallas_call(
        _norm_kernel,
        out_shape=jax.ShapeDtypeStruct((n, c, m2p), out_dtype),
        grid=grid,
        in_specs=[x_spec, part_spec, part_spec],
        out_specs=pl.BlockSpec((None, ct, tm), lambda ci, ni, mi: (ni, ci, mi)),
        compiler_params=cparams(("parallel", "parallel", "parallel")),
    )(xf, scale_il, shift_il)
    return out


# ---------------------------------------------------------------------------
# Fused single-pass path (whole channel slab resident in VMEM)
# ---------------------------------------------------------------------------
def _fused_kernel(x_ref, geff_ref, beff_ref, o_ref, *, count, eps):
    nb = x_ref.shape[0]
    ct = x_ref.shape[1]
    tm = x_ref.shape[2]
    nchunks = tm // 128
    unroll = min(8, nchunks)

    # --- per-lane sum / sumsq over the resident (N, ct, M) slab ------------
    def acc_n(i, carry):
        def acc_m(k, c2):
            s, q = c2
            off = pl.multiple_of(k * 128, 128)
            chunk = x_ref[i, :, pl.ds(off, 128)].astype(jnp.float32)
            return s + chunk, q + chunk * chunk
        return jax.lax.fori_loop(0, nchunks, acc_m, carry, unroll=unroll)

    zeros = jnp.zeros((ct, 128), jnp.float32)
    s, q = jax.lax.fori_loop(0, nb, acc_n, (zeros, zeros))

    # --- in-kernel stat fold (tiny: (ct, 128)) ------------------------------
    lane = jax.lax.broadcasted_iota(jnp.int32, (ct, 128), 1)
    is_real = (lane % 2) == 0
    zero = jnp.zeros_like(s)
    inv_cnt = 1.0 / count
    mr = jnp.sum(jnp.where(is_real, s, zero), axis=1, keepdims=True) * inv_cnt
    mi = jnp.sum(jnp.where(is_real, zero, s), axis=1, keepdims=True) * inv_cnt
    er = jnp.sum(jnp.where(is_real, q, zero), axis=1, keepdims=True) * inv_cnt
    ei = jnp.sum(jnp.where(is_real, zero, q), axis=1, keepdims=True) * inv_cnt
    var_r = jnp.maximum(er - mr * mr, 0.0)
    var_i = jnp.maximum(ei - mi * mi, 0.0)
    mean = jnp.where(is_real, mr, mi)                                   # (ct, 128)
    rstd = jnp.where(is_real, jax.lax.rsqrt(var_r + eps), jax.lax.rsqrt(var_i + eps))
    scale = geff_ref[...] * rstd            # 2*pi already folded into imag lanes
    shift = beff_ref[...] - mean * scale

    # --- normalize from the resident copy (no second HBM read) -------------
    def write_n(i, carry):
        def write_m(k, c2):
            off = pl.multiple_of(k * 128, 128)
            chunk = x_ref[i, :, pl.ds(off, 128)].astype(jnp.float32)
            o_ref[i, :, pl.ds(off, 128)] = (chunk * scale + shift).astype(o_ref.dtype)
            return c2
        return jax.lax.fori_loop(0, nchunks, write_m, carry, unroll=unroll)

    jax.lax.fori_loop(0, nb, write_n, 0)


def _fused(xf, gamma_eff, beta_eff, n, c, m2p, ct, cnt, eps, vmem_limit, out_dtype):
    geff_il = jnp.tile(gamma_eff, (1, 64))          # (C, 128), lane-interleaved
    beff_il = jnp.tile(beta_eff, (1, 64))
    kernel = functools.partial(_fused_kernel, count=cnt, eps=eps)
    out = pl.pallas_call(
        kernel,
        out_shape=jax.ShapeDtypeStruct((n, c, m2p), out_dtype),
        grid=(c // ct,),
        in_specs=[pl.BlockSpec((n, ct, m2p), lambda ci: (0, ci, 0)),
                  pl.BlockSpec((ct, 128), lambda ci: (ci, 0)),
                  pl.BlockSpec((ct, 128), lambda ci: (ci, 0))],
        out_specs=pl.BlockSpec((n, ct, m2p), lambda ci: (0, ci, 0)),
        compiler_params=pltpu.CompilerParams(
            dimension_semantics=("parallel",),
            vmem_limit_bytes=vmem_limit),
    )(xf, geff_il, beff_il)
    return out


# ---------------------------------------------------------------------------
# Public entry point
# ---------------------------------------------------------------------------
def complex_batch_norm_2d(x, gamma_r, beta_r, gamma_i, beta_i,
                          eps=_EPS, force_two_pass=False):
    """x: (N, C, H, W, 2). gamma_*/beta_*: (C,). Returns (N, C, H, W, 2)."""
    n, c, h, w, two = x.shape
    assert two == 2
    m2 = h * w * 2

    # Lane-padding for non-128-divisible spatial extents. Appended zeros
    # contribute nothing to sum / sumsq; the true N*H*W count is used below.
    if m2 % 128 != 0:
        target = 1024 if m2 >= 1024 else 128
        m2p = ((m2 + target - 1) // target) * target
        xf = jnp.pad(x.reshape(n, c, m2), ((0, 0), (0, 0), (0, m2p - m2)))
    else:
        m2p = m2
        xf = x.reshape(n, c, m2)           # contiguous reshape: no data movement

    cnt = float(n * h * w)
    vmem_limit, block_budget = _vmem_budget()

    # 2*pi of the imag branch folded into the per-lane affine params.
    gamma_eff = jnp.stack([gamma_r.astype(jnp.float32),
                           gamma_i.astype(jnp.float32) * _TWO_PI], axis=-1)   # (C, 2)
    beta_eff = jnp.stack([beta_r.astype(jnp.float32),
                          beta_i.astype(jnp.float32) * _TWO_PI], axis=-1)

    fused_ct = None if force_two_pass else _pick_fused_c_tile(c, n, m2p, vmem_limit)
    if fused_ct is not None:
        out = _fused(xf, gamma_eff, beta_eff, n, c, m2p, fused_ct, cnt, eps,
                     vmem_limit, x.dtype)
    else:
        out = _two_pass(xf, gamma_eff, beta_eff, n, c, m2p, cnt, eps,
                        vmem_limit, block_budget, x.dtype)

    if m2p != m2:
        out = out[:, :, :m2]
    return out.reshape(n, c, h, w, 2)      # contiguous reshape: no data movement


# ---------------------------------------------------------------------------
# Pure-JAX reference (PyTorch semantics)
# ---------------------------------------------------------------------------
def _reference(x, gamma_r, beta_r, gamma_i, beta_i):
    real = x[..., 0]
    imag = x[..., 1]

    def bn(v, g, b):
        mean = jnp.mean(v, axis=(0, 2, 3), keepdims=True)
        var = jnp.mean((v - mean) ** 2, axis=(0, 2, 3), keepdims=True)
        vh = (v - mean) / jnp.sqrt(var + _EPS)
        return vh * g.reshape(1, -1, 1, 1) + b.reshape(1, -1, 1, 1)

    r = bn(real, gamma_r, beta_r)
    i = bn(imag, gamma_i, beta_i) * _TWO_PI
    return jnp.stack([r, i], axis=-1)


if __name__ == "__main__":
    key = jax.random.PRNGKey(0)
    kx, kgr, kbr, kgi, kbi = jax.random.split(key, 5)

    N, C, H, W = 2, 4, 16, 16
    x = jax.random.normal(kx, (N, C, H, W, 2), dtype=jnp.float32) * 3.0 + 1.5

    gamma_r = 1.0 + 0.1 * jax.random.normal(kgr, (C,), jnp.float32)
    beta_r = 0.1 * jax.random.normal(kbr, (C,), jnp.float32)
    gamma_i = 1.0 + 0.1 * jax.random.normal(kgi, (C,), jnp.float32)
    beta_i = 0.1 * jax.random.normal(kbi, (C,), jnp.float32)

    ref = _reference(x, gamma_r, beta_r, gamma_i, beta_i)

    # Fused single-pass path (channel slab fits VMEM at this size).
    out_fused = jax.block_until_ready(
        complex_batch_norm_2d(x, gamma_r, beta_r, gamma_i, beta_i))
    assert out_fused.shape == (N, C, H, W, 2)
    assert jnp.max(jnp.abs(out_fused - ref)) < 1e-3

    # Two-pass path exercised explicitly so both code paths stay healthy.
    out_2p = jax.block_until_ready(
        complex_batch_norm_2d(x, gamma_r, beta_r, gamma_i, beta_i,
                              force_two_pass=True))
    assert jnp.max(jnp.abs(out_2p - ref)) < 1e-3

    print("KERNEL_OK")
</pallas_src>

<mosaic_0001>
module attributes {stable_mosaic.version = 11 : i64} {
  func.func @_fused_kernel(%arg0: i32, %arg1: memref<2x4x512xf32, #tpu.memory_space<vmem>>, %arg2: memref<4x128xf32, #tpu.memory_space<vmem>>, %arg3: memref<4x128xf32, #tpu.memory_space<vmem>>, %arg4: memref<2x4x512xf32, #tpu.memory_space<vmem>>) attributes {dimension_semantics = [#tpu.dimension_semantics<parallel>], iteration_bounds = array<i64: 1>, scalar_prefetch = 0 : i64, scratch_operands = 0 : i64, tpu.core_type = #tpu.core_type<tc>, window_params = [{transform_indices = @transform_0, window_bounds = array<i64: 2, 4, 512>}, {transform_indices = @transform_1, window_bounds = array<i64: 4, 128>}, {transform_indices = @transform_2, window_bounds = array<i64: 4, 128>}, {transform_indices = @transform_3, window_bounds = array<i64: 2, 4, 512>}]} {
    %cst = arith.constant 0.000000e+00 : f32
    %0 = vector.broadcast %cst : f32 to vector<4x128xf32>
    %c0_i32 = arith.constant 0 : i32
    %c2_i32 = arith.constant 2 : i32
    %1 = arith.addi %c0_i32, %c2_i32 : i32
    %c1_i32 = arith.constant 1 : i32
    %2:2 = scf.for %arg5 = %c0_i32 to %1 step %c1_i32 iter_args(%arg6 = %0, %arg7 = %0) -> (vector<4x128xf32>, vector<4x128xf32>)  : i32 {
      %c0_i32_28 = arith.constant 0 : i32
      %c128_i32 = arith.constant 128 : i32
      %73 = arith.muli %c0_i32_28, %c128_i32 : i32
      %74 = tpu.assume_multiple %73, 128 : i32
      %75 = arith.index_cast %arg5 : i32 to index
      %c0_29 = arith.constant 0 : index
      %76 = arith.index_cast %74 : i32 to index
      %77 = vector.load %arg1[%75, %c0_29, %76] : memref<2x4x512xf32, #tpu.memory_space<vmem>>, vector<1x4x128xf32>
      %78 = vector.shape_cast %77 : vector<1x4x128xf32> to vector<4x128xf32>
      %79 = arith.addf %arg6, %78 : vector<4x128xf32>
      %80 = arith.mulf %78, %78 : vector<4x128xf32>
      %81 = arith.addf %arg7, %80 : vector<4x128xf32>
      %c1_i32_30 = arith.constant 1 : i32
      %c128_i32_31 = arith.constant 128 : i32
      %82 = arith.muli %c1_i32_30, %c128_i32_31 : i32
      %83 = tpu.assume_multiple %82, 128 : i32
      %84 = arith.index_cast %arg5 : i32 to index
      %c0_32 = arith.constant 0 : index
      %85 = arith.index_cast %83 : i32 to index
      %86 = vector.load %arg1[%84, %c0_32, %85] : memref<2x4x512xf32, #tpu.memory_space<vmem>>, vector<1x4x128xf32>
      %87 = vector.shape_cast %86 : vector<1x4x128xf32> to vector<4x128xf32>
      %88 = arith.addf %79, %87 : vector<4x128xf32>
      %89 = arith.mulf %87, %87 : vector<4x128xf32>
      %90 = arith.addf %81, %89 : vector<4x128xf32>
      %c2_i32_33 = arith.constant 2 : i32
      %c128_i32_34 = arith.constant 128 : i32
      %91 = arith.muli %c2_i32_33, %c128_i32_34 : i32
      %92 = tpu.assume_multiple %91, 128 : i32
      %93 = arith.index_cast %arg5 : i32 to index
      %c0_35 = arith.constant 0 : index
      %94 = arith.index_cast %92 : i32 to index
      %95 = vector.load %arg1[%93, %c0_35, %94] : memref<2x4x512xf32, #tpu.memory_space<vmem>>, vector<1x4x128xf32>
      %96 = vector.shape_cast %95 : vector<1x4x128xf32> to vector<4x128xf32>
      %97 = arith.addf %88, %96 : vector<4x128xf32>
      %98 = arith.mulf %96, %96 : vector<4x128xf32>
      %99 = arith.addf %90, %98 : vector<4x128xf32>
      %c3_i32 = arith.constant 3 : i32
      %c128_i32_36 = arith.constant 128 : i32
      %100 = arith.muli %c3_i32, %c128_i32_36 : i32
      %101 = tpu.assume_multiple %100, 128 : i32
      %102 = arith.index_cast %arg5 : i32 to index
      %c0_37 = arith.constant 0 : index
      %103 = arith.index_cast %101 : i32 to index
      %104 = vector.load %arg1[%102, %c0_37, %103] : memref<2x4x512xf32, #tpu.memory_space<vmem>>, vector<1x4x128xf32>
      %105 = vector.shape_cast %104 : vector<1x4x128xf32> to vector<4x128xf32>
      %106 = arith.addf %97, %105 : vector<4x128xf32>
      %107 = arith.mulf %105, %105 : vector<4x128xf32>
      %108 = arith.addf %99, %107 : vector<4x128xf32>
      %c4_i32 = arith.constant 4 : i32
      scf.yield %106, %108 : vector<4x128xf32>, vector<4x128xf32>
    }
    %c2_i32_0 = arith.constant 2 : i32
    %3 = tpu.iota {dimensions = array<i32: 1>} : vector<4x128xi32>
    %c2_i32_1 = arith.constant 2 : i32
    %c0_i32_2 = arith.constant 0 : i32
    %4 = arith.cmpi eq, %c2_i32_1, %c0_i32_2 : i32
    %c1_i32_3 = arith.constant 1 : i32
    %5 = arith.select %4, %c1_i32_3, %c2_i32_1 : i32
    %6 = vector.broadcast %5 : i32 to vector<4x128xi32>
    %7 = arith.remsi %3, %6 : vector<4x128xi32>
    %c0_i32_4 = arith.constant 0 : i32
    %8 = vector.broadcast %c0_i32_4 : i32 to vector<4x128xi32>
    %9 = arith.cmpi ne, %7, %8 : vector<4x128xi32>
    %c0_i32_5 = arith.constant 0 : i32
    %10 = vector.broadcast %c0_i32_5 : i32 to vector<4x128xi32>
    %11 = arith.cmpi slt, %7, %10 : vector<4x128xi32>
    %c0_i32_6 = arith.constant 0 : i32
    %12 = arith.cmpi slt, %5, %c0_i32_6 : i32
    %13 = vector.broadcast %12 : i1 to vector<4x128xi1>
    %14 = vector.broadcast %13 : vector<4x128xi1> to vector<4x128xi1>
    %15 = arith.xori %11, %14 : vector<4x128xi1>
    %16 = arith.andi %15, %9 : vector<4x128xi1>
    %17 = vector.broadcast %5 : i32 to vector<4x128xi32>
    %18 = arith.addi %7, %17 : vector<4x128xi32>
    %19 = arith.select %16, %18, %7 : vector<4x128xi1>, vector<4x128xi32>
    %c0_i32_7 = arith.constant 0 : i32
    %20 = vector.broadcast %c0_i32_7 : i32 to vector<4x128xi32>
    %21 = arith.cmpi eq, %19, %20 : vector<4x128xi32>
    %cst_8 = arith.constant 0.000000e+00 : f32
    %22 = vector.broadcast %cst_8 : f32 to vector<4x128xf32>
    %23 = arith.select %21, %2#0, %22 : vector<4x128xi1>, vector<4x128xf32>
    %cst_9 = arith.constant dense<0.000000e+00> : vector<4xf32>
    %24 = vector.multi_reduction <add>, %23, %cst_9 [1] : vector<4x128xf32> to vector<4xf32>
    %25 = vector.shape_cast %24 : vector<4xf32> to vector<4x1xf32>
    %cst_10 = arith.constant 0.001953125 : f32
    %26 = vector.broadcast %cst_10 : f32 to vector<4x1xf32>
    %27 = arith.mulf %25, %26 : vector<4x1xf32>
    %28 = arith.select %21, %22, %2#0 : vector<4x128xi1>, vector<4x128xf32>
    %cst_11 = arith.constant dense<0.000000e+00> : vector<4xf32>
    %29 = vector.multi_reduction <add>, %28, %cst_11 [1] : vector<4x128xf32> to vector<4xf32>
    %30 = vector.shape_cast %29 : vector<4xf32> to vector<4x1xf32>
    %cst_12 = arith.constant 0.001953125 : f32
    %31 = vector.broadcast %cst_12 : f32 to vector<4x1xf32>
    %32 = arith.mulf %30, %31 : vector<4x1xf32>
    %33 = arith.select %21, %2#1, %22 : vector<4x128xi1>, vector<4x128xf32>
    %cst_13 = arith.constant dense<0.000000e+00> : vector<4xf32>
    %34 = vector.multi_reduction <add>, %33, %cst_13 [1] : vector<4x128xf32> to vector<4xf32>
    %35 = vector.shape_cast %34 : vector<4xf32> to vector<4x1xf32>
    %cst_14 = arith.constant 0.001953125 : f32
    %36 = vector.broadcast %cst_14 : f32 to vector<4x1xf32>
    %37 = arith.mulf %35, %36 : vector<4x1xf32>
    %38 = arith.select %21, %22, %2#1 : vector<4x128xi1>, vector<4x128xf32>
    %cst_15 = arith.constant dense<0.000000e+00> : vector<4xf32>
    %39 = vector.multi_reduction <add>, %38, %cst_15 [1] : vector<4x128xf32> to vector<4xf32>
    %40 = vector.shape_cast %39 : vector<4xf32> to vector<4x1xf32>
    %cst_16 = arith.constant 0.001953125 : f32
    %41 = vector.broadcast %cst_16 : f32 to vector<4x1xf32>
    %42 = arith.mulf %40, %41 : vector<4x1xf32>
    %43 = arith.mulf %27, %27 : vector<4x1xf32>
    %44 = arith.subf %37, %43 : vector<4x1xf32>
    %cst_17 = arith.constant 0.000000e+00 : f32
    %45 = vector.broadcast %cst_17 : f32 to vector<4x1xf32>
    %46 = arith.maximumf %44, %45 : vector<4x1xf32>
    %47 = arith.mulf %32, %32 : vector<4x1xf32>
    %48 = arith.subf %42, %47 : vector<4x1xf32>
    %cst_18 = arith.constant 0.000000e+00 : f32
    %49 = vector.broadcast %cst_18 : f32 to vector<4x1xf32>
    %50 = arith.maximumf %48, %49 : vector<4x1xf32>
    %51 = vector.shape_cast %27 : vector<4x1xf32> to vector<4x1xf32>
    %52 = vector.broadcast %51 : vector<4x1xf32> to vector<4x128xf32>
    %53 = vector.shape_cast %32 : vector<4x1xf32> to vector<4x1xf32>
    %54 = vector.broadcast %53 : vector<4x1xf32> to vector<4x128xf32>
    %55 = arith.select %21, %52, %54 : vector<4x128xi1>, vector<4x128xf32>
    %cst_19 = arith.constant 9.99999974E-6 : f32
    %56 = vector.broadcast %cst_19 : f32 to vector<4x1xf32>
    %57 = arith.addf %46, %56 : vector<4x1xf32>
    %58 = math.rsqrt %57 : vector<4x1xf32>
    %cst_20 = arith.constant 9.99999974E-6 : f32
    %59 = vector.broadcast %cst_20 : f32 to vector<4x1xf32>
    %60 = arith.addf %50, %59 : vector<4x1xf32>
    %61 = math.rsqrt %60 : vector<4x1xf32>
    %62 = vector.shape_cast %58 : vector<4x1xf32> to vector<4x1xf32>
    %63 = vector.broadcast %62 : vector<4x1xf32> to vector<4x128xf32>
    %64 = vector.shape_cast %61 : vector<4x1xf32> to vector<4x1xf32>
    %65 = vector.broadcast %64 : vector<4x1xf32> to vector<4x128xf32>
    %66 = arith.select %21, %63, %65 : vector<4x128xi1>, vector<4x128xf32>
    %c0 = arith.constant 0 : index
    %c0_21 = arith.constant 0 : index
    %67 = vector.load %arg2[%c0, %c0_21] : memref<4x128xf32, #tpu.memory_space<vmem>>, vector<4x128xf32>
    %68 = arith.mulf %67, %66 : vector<4x128xf32>
    %c0_22 = arith.constant 0 : index
    %c0_23 = arith.constant 0 : index
    %69 = vector.load %arg3[%c0_22, %c0_23] : memref<4x128xf32, #tpu.memory_space<vmem>>, vector<4x128xf32>
    %70 = arith.mulf %55, %68 : vector<4x128xf32>
    %71 = arith.subf %69, %70 : vector<4x128xf32>
    %c0_i32_24 = arith.constant 0 : i32
    %c2_i32_25 = arith.constant 2 : i32
    %72 = arith.addi %c0_i32_24, %c2_i32_25 : i32
    %c1_i32_26 = arith.constant 1 : i32
    scf.for %arg5 = %c0_i32_24 to %72 step %c1_i32_26  : i32 {
      %c0_i32_28 = arith.constant 0 : i32
      %c128_i32 = arith.constant 128 : i32
      %73 = arith.muli %c0_i32_28, %c128_i32 : i32
      %74 = tpu.assume_multiple %73, 128 : i32
      %75 = arith.index_cast %arg5 : i32 to index
      %c0_29 = arith.constant 0 : index
      %76 = arith.index_cast %74 : i32 to index
      %77 = vector.load %arg1[%75, %c0_29, %76] : memref<2x4x512xf32, #tpu.memory_space<vmem>>, vector<1x4x128xf32>
      %78 = vector.shape_cast %77 : vector<1x4x128xf32> to vector<4x128xf32>
      %79 = arith.mulf %78, %68 : vector<4x128xf32>
      %80 = arith.addf %79, %71 : vector<4x128xf32>
      %81 = arith.index_cast %arg5 : i32 to index
      %c0_30 = arith.constant 0 : index
      %82 = arith.index_cast %74 : i32 to index
      %83 = vector.load %arg4[%81, %c0_30, %82] : memref<2x4x512xf32, #tpu.memory_space<vmem>>, vector<1x4x128xf32>
      %84 = vector.shape_cast %83 : vector<1x4x128xf32> to vector<4x128xf32>
      %85 = vector.shape_cast %80 : vector<4x128xf32> to vector<1x4x128xf32>
      tpu.vector_store %arg4[%81, %c0_30, %82], %85 {strides = array<i32>} : memref<2x4x512xf32, #tpu.memory_space<vmem>>, vector<1x4x128xf32>,
      %c1_i32_31 = arith.constant 1 : i32
      %c128_i32_32 = arith.constant 128 : i32
      %86 = arith.muli %c1_i32_31, %c128_i32_32 : i32
      %87 = tpu.assume_multiple %86, 128 : i32
      %88 = arith.index_cast %arg5 : i32 to index
      %c0_33 = arith.constant 0 : index
      %89 = arith.index_cast %87 : i32 to index
      %90 = vector.load %arg1[%88, %c0_33, %89] : memref<2x4x512xf32, #tpu.memory_space<vmem>>, vector<1x4x128xf32>
      %91 = vector.shape_cast %90 : vector<1x4x128xf32> to vector<4x128xf32>
      %92 = arith.mulf %91, %68 : vector<4x128xf32>
      %93 = arith.addf %92, %71 : vector<4x128xf32>
      %94 = arith.index_cast %arg5 : i32 to index
      %c0_34 = arith.constant 0 : index
      %95 = arith.index_cast %87 : i32 to index
      %96 = vector.load %arg4[%94, %c0_34, %95] : memref<2x4x512xf32, #tpu.memory_space<vmem>>, vector<1x4x128xf32>
      %97 = vector.shape_cast %96 : vector<1x4x128xf32> to vector<4x128xf32>
      %98 = vector.shape_cast %93 : vector<4x128xf32> to vector<1x4x128xf32>
      tpu.vector_store %arg4[%94, %c0_34, %95], %98 {strides = array<i32>} : memref<2x4x512xf32, #tpu.memory_space<vmem>>, vector<1x4x128xf32>,
      %c2_i32_35 = arith.constant 2 : i32
      %c128_i32_36 = arith.constant 128 : i32
      %99 = arith.muli %c2_i32_35, %c128_i32_36 : i32
      %100 = tpu.assume_multiple %99, 128 : i32
      %101 = arith.index_cast %arg5 : i32 to index
      %c0_37 = arith.constant 0 : index
      %102 = arith.index_cast %100 : i32 to index
      %103 = vector.load %arg1[%101, %c0_37, %102] : memref<2x4x512xf32, #tpu.memory_space<vmem>>, vector<1x4x128xf32>
      %104 = vector.shape_cast %103 : vector<1x4x128xf32> to vector<4x128xf32>
      %105 = arith.mulf %104, %68 : vector<4x128xf32>
      %106 = arith.addf %105, %71 : vector<4x128xf32>
      %107 = arith.index_cast %arg5 : i32 to index
      %c0_38 = arith.constant 0 : index
      %108 = arith.index_cast %100 : i32 to index
      %109 = vector.load %arg4[%107, %c0_38, %108] : memref<2x4x512xf32, #tpu.memory_space<vmem>>, vector<1x4x128xf32>
      %110 = vector.shape_cast %109 : vector<1x4x128xf32> to vector<4x128xf32>
      %111 = vector.shape_cast %106 : vector<4x128xf32> to vector<1x4x128xf32>
      tpu.vector_store %arg4[%107, %c0_38, %108], %111 {strides = array<i32>} : memref<2x4x512xf32, #tpu.memory_space<vmem>>, vector<1x4x128xf32>,
      %c3_i32 = arith.constant 3 : i32
      %c128_i32_39 = arith.constant 128 : i32
      %112 = arith.muli %c3_i32, %c128_i32_39 : i32
      %113 = tpu.assume_multiple %112, 128 : i32
      %114 = arith.index_cast %arg5 : i32 to index
      %c0_40 = arith.constant 0 : index
      %115 = arith.index_cast %113 : i32 to index
      %116 = vector.load %arg1[%114, %c0_40, %115] : memref<2x4x512xf32, #tpu.memory_space<vmem>>, vector<1x4x128xf32>
      %117 = vector.shape_cast %116 : vector<1x4x128xf32> to vector<4x128xf32>
      %118 = arith.mulf %117, %68 : vector<4x128xf32>
      %119 = arith.addf %118, %71 : vector<4x128xf32>
      %120 = arith.index_cast %arg5 : i32 to index
      %c0_41 = arith.constant 0 : index
      %121 = arith.index_cast %113 : i32 to index
      %122 = vector.load %arg4[%120, %c0_41, %121] : memref<2x4x512xf32, #tpu.memory_space<vmem>>, vector<1x4x128xf32>
      %123 = vector.shape_cast %122 : vector<1x4x128xf32> to vector<4x128xf32>
      %124 = vector.shape_cast %119 : vector<4x128xf32> to vector<1x4x128xf32>
      tpu.vector_store %arg4[%120, %c0_41, %121], %124 {strides = array<i32>} : memref<2x4x512xf32, #tpu.memory_space<vmem>>, vector<1x4x128xf32>,
      %c4_i32 = arith.constant 4 : i32
    }
    %c2_i32_27 = arith.constant 2 : i32
    return
  }
  func.func @transform_0(%arg0: i32) -> (i32, i32, i32) {
    %c0_i32 = arith.constant 0 : i32
    %c0_i32_0 = arith.constant 0 : i32
    %c0_i32_1 = arith.constant 0 : i32
    return %c0_i32, %arg0, %c0_i32_0 : i32, i32, i32
  }
  func.func @transform_1(%arg0: i32) -> (i32, i32) {
    %c0_i32 = arith.constant 0 : i32
    %c0_i32_0 = arith.constant 0 : i32
    return %arg0, %c0_i32 : i32, i32
  }
  func.func @transform_2(%arg0: i32) -> (i32, i32) {
    %c0_i32 = arith.constant 0 : i32
    %c0_i32_0 = arith.constant 0 : i32
    return %arg0, %c0_i32 : i32, i32
  }
  func.func @transform_3(%arg0: i32) -> (i32, i32, i32) {
    %c0_i32 = arith.constant 0 : i32
    %c0_i32_0 = arith.constant 0 : i32
    %c0_i32_1 = arith.constant 0 : i32
    return %c0_i32, %arg0, %c0_i32_0 : i32, i32, i32
  }
}

</mosaic_0001>

<bundles_post_ra>
// kernel: tpu_custom_call.1
= control target key start
LH: loop header
LB: loop body
LE: loop exit
PB: predicated region body
PF: predicated region fallthrough
CT: control target
= control target key end

     0   :  { %8 = vsyncpa [#allocation3], 0  ;;  %s528_s0 = inlined_call_operand.hbm [shape: f32[2,4,512], index: 0, kind: input, shape index: {}]   ;;  %s529_s1 = inlined_call_operand.hbm [shape: f32[4,128], index: 1, kind: input, shape index: {}]   ;;  %s530_s2 = inlined_call_operand.vmem [shape: f32[4,128], index: 2, kind: input, shape index: {}]   ;;  %s531_s3 = inlined_call_operand.hbm [shape: f32[2,4,512], index: 3, kind: output, shape index: {}]  }
   0x1   :  { %9 = vsyncpa [#allocation6], 0 }
   0x2   :  { %10 = vsyncpa [#allocation4], 0  ;;  %s442_s12 = smov [#allocation2]   ;;  %s338_s16 = scalar_lea.hbm %s528_s0, 512 }
   0x3   :  { %s16_s13 = sshll.u32 %s442_s12, 4  ;;  %p339_p0 = scmp.ne.s32.totalorder %s528_s0, %s338_s16  ;;  %s17_s13 = int_to_ptr.vmem [resolvable:$true] %s16_s13 }
   0x4   :  { %p342_p1 = scmp.lt.u32.totalorder %s338_s16, %s528_s0 }
   0x6   :  { %p344_p2 = pnand %p342_p1, %p339_p0 }
   0x8   :  { %347 = shalt.err (!%p344_p2)
}
   0x9   :  { %s348_s21 = scalar_lea.vmem %s17_s13, 512  ;;  %p353_p4 = scmp.lt.s32.totalorder %s17_s13, %s17_s13 }
   0xa   :  { %p349_p3 = scmp.ne.s32.totalorder %s17_s13, %s348_s21  ;;  %p354_p5 = scmp.lt.s32.totalorder %s348_s21, %s348_s21 }
   0xc   :  { %p355_p6 = por %p354_p5, %p353_p4 }
   0xe   :  { %p356_p7 = pnand %p355_p6, %p349_p3 }
  0x10   :  { %359 = shalt.err (!%p356_p7)
}
  0x11   :  { %s443_s22 = smov 256   ;;  %s444_s23 = smov 16  }
  0x12   :  { %22 = dma.hbm_to_vmem [thread:$0]  %s528_s0, 512, %s17_s13, [#allocation3], %s443_s22, %s443_s22, %s444_s23  }
  0x13   :  { %s445_s26 = smov [#allocation5]   ;;  %s360_s30 = scalar_lea.hbm %s529_s1, 64 }
  0x14   :  { %s29_s27 = sshll.u32 %s445_s26, 4  ;;  %p361_p8 = scmp.ne.s32.totalorder %s529_s1, %s360_s30  ;;  %s30_s27 = int_to_ptr.vmem [resolvable:$true] %s29_s27 }
  0x15   :  { %p364_p9 = scmp.lt.u32.totalorder %s360_s30, %s529_s1 }
  0x17   :  { %p366_p10 = pnand %p364_p9, %p361_p8 }
  0x19   :  { %369 = shalt.err (!%p366_p10)
}
  0x1a   :  { %s370_s8 = scalar_lea.vmem %s30_s27, 64  ;;  %p375_p12 = scmp.lt.s32.totalorder %s30_s27, %s30_s27 }
  0x1b   :  { %p371_p11 = scmp.ne.s32.totalorder %s30_s27, %s370_s8  ;;  %p376_p13 = scmp.lt.s32.totalorder %s370_s8, %s370_s8 }
  0x1d   :  { %p377_p0 = por %p376_p13, %p375_p12 }
  0x1f   :  { %p378_p1 = pnand %p377_p0, %p371_p11 }
  0x21   :  { %381 = shalt.err (!%p378_p1)
}
  0x22   :  { %32 = dma.hbm_to_vmem [thread:$0]  %s529_s1, 64, %s30_s27, [#allocation6]  }
  0x23   :  { %420 = dma.done.wait [#allocation3], 512  }
  0x24   :  { %421 = vsyncadd [#allocation3], 4294966784 }
  0x25   :  { %422 = dma.done.wait [#allocation6], 64  }
  0x26   :  { %423 = vsyncadd [#allocation6], 4294967232  ;;  %v426_v0 = vmov 0.0   ;;  %v430_v1 = vmov 0.0   ;;  %s434_s10 = smov 0  }
  0x27 LB: > { %s285_s11 = sshll.u32 %s436_s10, 4  ;;  %s46_s10 = sadd.s32 1, %s436_s10   ;;  %s436_s10 = sphi %s434_s10, %s46_s10   ;;  %v432_v1 = vphi %v430_v1, %v431_v1   ;;  %v428_v0 = vphi %v426_v0, %v427_v0  }
  0x28   : > { %s52_s12 = scalar_lea.vmem [#allocation2], %s285_s11  ;;  %p43_p2 = scmp.ge.s32.totalorder %s46_s10, 2  }
  0x29   : > { %v53_v2 = vld [vmem:[%s52_s12] sm:$0xf]  ;;  %v257_v3 = vld [vmem:[%s52_s12 + $0x4] sm:$0xf]  ;;  %v260_v4 = vld [vmem:[%s52_s12 + $0x8] sm:$0xf]  ;;  %v78_v18 = vlaneseq (%p43_p2) }
  0x2a   : > { %v54_v5 = vadd.f32 %v432_v1, %v53_v2  ;;  %v55_v6 = vmul.f32 %v53_v2, %v53_v2  ;;  %v62_v7 = vmul.f32 %v257_v3, %v257_v3  ;;  %v263_v8 = vld [vmem:[%s52_s12 + $0xc] sm:$0xf]  ;;  %v69_v11 = vmul.f32 %v260_v4, %v260_v4  ;;  %v126_v47 = vld [vmem:[#allocation5] sm:$0xf] (%p43_p2)  ;;  %s438_s14 = smov (%p43_p2), 0  }
  0x2b   : > { %v76_v14 = vmul.f32 %v263_v8, %v263_v8  ;;  %v79_v19 = vand.u32 (%p43_p2), 127, %v78_v18  ;;  %vm94_vm0 = vcmask (%p43_p2), 1043456   ;;  %v128_v52 = vld [vmem:[%s530_s2] sm:$0xf] (%p43_p2) }
  0x2c   : > { %v56_v9 = vadd.f32 %v428_v0, %v55_v6  ;;  %v61_v10 = vadd.f32 %v257_v3, %v54_v5 }
  0x2d   :  { %v84_v20 = vand.u32 (%p43_p2), 1, %v79_v19 }
  0x2e   : > { %v63_v12 = vadd.f32 %v62_v7, %v56_v9  ;;  %v68_v13 = vadd.f32 %v260_v4, %v61_v10  ;;  %45 = sbr.rel (!%p43_p2) target bundleno = 39 (0x27), region = 66 }
  0x2f   :  { %vm494_vm1 = vcmp.eq.s32.totalorder (%p43_p2), %v84_v20, 0 }
  0x30   : > { %v70_v15 = vadd.f32 %v69_v11, %v63_v12  ;;  %v75_v16 = vadd.f32 %v263_v8, %v68_v13  }
  0x32   : > { %v77_v17 = vadd.f32 %v76_v14, %v70_v15   ;;  %v431_v1 = vmov %v75_v16   ;;  %v93_v22 = vsel (%p43_p2), %vm494_vm1, %v75_v16, 0.0  ;;  %v99_v24 = vsel (%p43_p2), %vm494_vm1, 0.0, %v75_v16 }
  0x33   :  { %v95_v26 = vsel (%p43_p2), %vm94_vm0, %v93_v22, 0.0  ;;  %v100_v28 = vsel (%p43_p2), %vm94_vm0, %v99_v24, 0.0 }
  0x34   : > { %v427_v0 = vmov %v77_v17   ;;  %v104_v23 = vsel (%p43_p2), %vm494_vm1, %v77_v17, 0.0  ;;  %v109_v25 = vsel (%p43_p2), %vm494_vm1, 0.0, %v77_v17  ;;  %96 = vadd.xlane.f32.xlu0 (%p43_p2), %v95_v26 }
  0x35   :  { %v105_v27 = vsel %vm94_vm0, %v104_v23, 0.0  ;;  %v110_v29 = vsel %vm94_vm0, %v109_v25, 0.0 }
  0x36   :  { %106 = vadd.xlane.f32.xlu1 %v105_v27 }
  0x38   :  { %101 = vadd.xlane.f32.xlu0 %v100_v28 }
  0x3a   :  { %111 = vadd.xlane.f32.xlu1 %v110_v29 }
  0xc1   :  { %v97_v30 = vpop.xlane.xlu0 %96 }
  0xc2   :  { %v98_v32 = vmul.f32 0.001953125, %v97_v30 }
  0xc3   :  { %v107_v31 = vpop.xlane.xlu1 %106 }
  0xc4   :  { %v108_v33 = vmul.f32 0.001953125, %v107_v31  ;;  %v114_v34 = vmul.f32 %v98_v32, %v98_v32 }
  0xc5   :  { %v102_v35 = vpop.xlane.xlu0 %101 }
  0xc6   :  { %v115_v37 = vsub.f32 %v108_v33, %v114_v34  ;;  %v103_v38 = vmul.f32 0.001953125, %v102_v35 }
  0xc7   :  { %v112_v36 = vpop.xlane.xlu1 %111 }
  0xc8   :  { %v113_v39 = vmul.f32 0.001953125, %v112_v36  ;;  %v116_v40 = vmax.f32 %v115_v37, 0.0  ;;  %v117_v41 = vmul.f32 %v103_v38, %v103_v38  ;;  %v120_v51 = vsel %vm494_vm1, %v98_v32, %v103_v38 }
  0xca   :  { %v118_v42 = vsub.f32 %v113_v39, %v117_v41  ;;  %v121_v43 = vadd.f32 1e-05, %v116_v40 }
  0xcc   :  { %v119_v44 = vmax.f32 %v118_v42, 0.0  ;;  %334 = vrsqrt.f32 %v121_v43 }
  0xce   :  { %v123_v45 = vadd.f32 1e-05, %v119_v44 }
  0xd0   :  { %336 = vrsqrt.f32 %v123_v45 }
  0xd6   :  { %v335_v46 = vpop.eup %334 }
  0xda   :  { %v337_v48 = vpop.eup %336 }
  0xdb   :  { %v125_v49 = vsel %vm494_vm1, %v335_v46, %v337_v48 }
  0xdc   :  { %v127_v50 = vmul.f32 %v126_v47, %v125_v49 }
  0xde   :  { %v129_v53 = vmul.f32 %v127_v50, %v120_v51 }
  0xe0   :  { %v130_v54 = vsub.f32 %v128_v52, %v129_v53 }
  0xe1 LB: > { %s289_s15 = sshll.u32 %s440_s14, 4  ;;  %s136_s14 = sadd.s32 1, %s440_s14   ;;  %s440_s14 = sphi %s438_s14, %s136_s14  }
  0xe2   : > { %s140_s16 = scalar_lea.vmem [#allocation2], %s289_s15  ;;  %s145_s2 = scalar_lea.vmem [#allocation7], %s289_s15 }
  0xe3   : > { %v141_v55 = vld [vmem:[%s140_s16] sm:$0xf]  ;;  %v269_v56 = vld [vmem:[%s140_s16 + $0x4] sm:$0xf]  ;;  %v275_v57 = vld [vmem:[%s140_s16 + $0x8] sm:$0xf] }
  0xe4   : > { %v142_v58 = vmul.f32 %v141_v55, %v127_v50  ;;  %v151_v59 = vmul.f32 %v269_v56, %v127_v50  ;;  %v160_v60 = vmul.f32 %v275_v57, %v127_v50  ;;  %v281_v61 = vld [vmem:[%s140_s16 + $0xc] sm:$0xf]  ;;  %p133_p3 = scmp.ge.s32.totalorder %s136_s14, 2  }
  0xe5   : > { %v169_v62 = vmul.f32 %v281_v61, %v127_v50  ;;  %s446_s17 = smov (%p133_p3), [#allocation7]  }
  0xe6   : > { %v143_v63 = vadd.f32 %v142_v58, %v130_v54  ;;  %v152_v0 = vadd.f32 %v151_v59, %v130_v54  ;;  %v161_v1 = vadd.f32 %v160_v60, %v130_v54  ;;  %135 = sbr.rel (!%p133_p3) target bundleno = 225 (0xe1), region = 77  ;;  %s179_s18 = sshll.u32 (%p133_p3), %s446_s17, 4  ;;  %s180_s18 = int_to_ptr.vmem [resolvable:$true] %s179_s18 }
  0xe7   : > { %v170_v2 = vadd.f32 %v169_v62, %v130_v54  ;;  %s382_s19 = scalar_lea.vmem (%p133_p3), %s180_s18, 512  ;;  %p387_p5 = scmp.lt.s32.totalorder (%p133_p3), %s180_s18, %s180_s18 }
  0xe8   : > { %146 = vst [vmem:[%s145_s2] sm:$0xf] %v143_v63  ;;  %272 = vst [vmem:[%s145_s2 + $0x4] sm:$0xf] %v152_v0  ;;  %p383_p4 = scmp.ne.s32.totalorder (%p133_p3), %s180_s18, %s382_s19  ;;  %p388_p6 = scmp.lt.s32.totalorder (%p133_p3), %s382_s19, %s382_s19 }
  0xe9   : > { %278 = vst [vmem:[%s145_s2 + $0x8] sm:$0xf] %v161_v1  ;;  %284 = vst [vmem:[%s145_s2 + $0xc] sm:$0xf] %v170_v2 }
  0xea   :  { %p389_p7 = por (%p133_p3), %p388_p6, %p387_p5 }
  0xec   :  { %p390_p8 = pnand (%p133_p3), %p389_p7, %p383_p4 }
  0xee   :  { %393 = shalt.err (!%p390_p8)
}
  0xef   :  { %s394_s24 = scalar_lea.hbm %s531_s3, 512 }
  0xf0   :  { %p395_p9 = scmp.ne.s32.totalorder %s531_s3, %s394_s24  ;;  %p398_p10 = scmp.lt.u32.totalorder %s394_s24, %s531_s3 }
  0xf2   :  { %p400_p11 = pnand %p398_p10, %p395_p9 }
  0xf4   :  { %403 = shalt.err (!%p400_p11)
}
  0xf5   :  { %185 = dma.vmem_to_hbm [thread:$0]  %s180_s18, 512, %s531_s3, [#allocation4], %s443_s22, %s443_s22, %s444_s23  }
  0xf6   :  { %424 = dma.done.wait [#allocation4], 512  }
  0xf7   :  { %425 = vsyncadd [#allocation4], 4294966784 }
  0xf8   :  { %189 = vsyncpa [#allocation3], 1 }
  0xf9   :  { %190 = vsyncpa [#allocation6], 1 }
  0xfa   :  { %191 = vsyncpa [#allocation4], 1 }

</bundles_post_ra>
